<compile_context>
chip_gen: v6e
topology: v6e:2x2x1
jax: 0.10.0
libtpu: 0.0.40
codegen_flags: <defaults>
</compile_context>

<pallas_src>
import jax
import jax.numpy as jnp
from jax.experimental import pallas as pl
from jax.experimental.pallas import tpu as pltpu


# ---------------------------------------------------------------------------
# Pallas kernel: one fused linear  y = x @ W_all + b_all
# ---------------------------------------------------------------------------
def _film_fused_kernel(x_ref, w_ref, b_ref, o_ref):
    # x_ref: (B, C)  w_ref: (C, F_pad)  b_ref: (1, F_pad)  o_ref: (B, F_pad)
    o_ref[...] = (
        jnp.dot(x_ref[...], w_ref[...], preferred_element_type=jnp.float32)
        + b_ref[...]
    )


def film_fused_linear(conditions, w_all_pad, b_all_pad):
    """y = conditions @ w_all_pad + b_all_pad in a single Pallas call.

    conditions: (B, C)       f32 (no padding; full-array block)
    w_all_pad:  (C, F_pad)   f32, F_pad % 128 == 0  (pre-padded at param build)
    b_all_pad:  (1, F_pad)   f32
    returns:    (B, F_pad)   f32
    """
    B, C = conditions.shape
    Cw, F_pad = w_all_pad.shape
    assert Cw == C and F_pad % 128 == 0

    cost = pl.CostEstimate(
        flops=2 * B * C * F_pad,
        transcendentals=0,
        bytes_accessed=4 * (B * C + C * F_pad + F_pad + B * F_pad),
    )

    # No grid: whole problem is far below a single MXU/vreg tile on every TPU
    # generation, so any grid step would be pure launch overhead.
    # TODO(synk): if F_total/B ever scale up (real DenseUNet training sizes),
    # add a 1-D grid over F with block (B, 512) and
    # dimension_semantics=("parallel",) so v7x's two TensorCores split the work.
    return pl.pallas_call(
        _film_fused_kernel,
        out_shape=jax.ShapeDtypeStruct((B, F_pad), jnp.float32),
        in_specs=[
            pl.BlockSpec(memory_space=pltpu.MemorySpace.VMEM),
            pl.BlockSpec(memory_space=pltpu.MemorySpace.VMEM),
            pl.BlockSpec(memory_space=pltpu.MemorySpace.VMEM),
        ],
        out_specs=pl.BlockSpec(memory_space=pltpu.MemorySpace.VMEM),
        cost_estimate=cost,
    )(conditions, w_all_pad, b_all_pad)


# ---------------------------------------------------------------------------
# FiLM: nested-dict parameter construction (mirrors the PyTorch code)
# ---------------------------------------------------------------------------
def create_film_params(film_meta, condition_size, key):
    """Build nested dict of (weight, bias) matching film_meta structure.

    Weights are stored as (condition_size, num_features), i.e. transposed vs.
    PyTorch's (num_features, condition_size) nn.Linear storage.
    """
    params = {}
    for module_name, value in film_meta.items():
        key, sub = jax.random.split(key)
        if isinstance(value, int):
            num_features = value
            # Deterministic init (stand-in for init_layer: xavier-ish W, zero bias).
            scale = 1.0 / jnp.sqrt(jnp.float32(condition_size))
            w = (
                jax.random.normal(sub, (condition_size, num_features), jnp.float32)
                * scale
            )
            b = jnp.zeros((num_features,), jnp.float32)
            params[module_name] = (w, b)
        elif isinstance(value, dict):
            params[module_name] = create_film_params(value, condition_size, sub)
    return params


def _flatten_leaves(params, path=()):
    """Depth-first (insertion-order) list of (path, (w, b)) leaves."""
    leaves = []
    for name, p in params.items():
        if isinstance(p, dict):
            leaves.extend(_flatten_leaves(p, path + (name,)))
        else:
            leaves.append((path + (name,), p))
    return leaves


def build_fused_film_params(params):
    """One-time hoist: concat all leaf linears along the feature axis and pad
    the feature dim to a lane multiple (128).

    Returns a dict with the pre-padded fused weight/bias constants plus the
    leaf (path, offset, num_features) metadata needed to slice results back
    into the nested structure.  Do this ONCE (param build / load time), not
    per forward step.
    """
    leaves = _flatten_leaves(params)
    if not leaves:
        return None

    w_all = jnp.concatenate([w for _, (w, _) in leaves], axis=1)   # (C, F_total)
    b_all = jnp.concatenate([b for _, (_, b) in leaves], axis=0)   # (F_total,)
    F_total = w_all.shape[1]
    F_pad = max(128, ((F_total + 127) // 128) * 128)

    w_all_pad = jnp.pad(w_all, ((0, 0), (0, F_pad - F_total)))
    b_all_pad = jnp.pad(b_all, (0, F_pad - F_total)).reshape(1, F_pad)

    leaf_specs = []
    offset = 0
    for path, (w, _) in leaves:
        f = w.shape[1]
        leaf_specs.append((path, offset, f))
        offset += f

    return {
        "w_all_pad": w_all_pad,      # (C, F_pad) f32
        "b_all_pad": b_all_pad,      # (1, F_pad) f32
        "leaf_specs": tuple(leaf_specs),
        "f_total": F_total,
    }


# ---------------------------------------------------------------------------
# Forward: one fused Pallas matmul, then slice back into the nested structure
# ---------------------------------------------------------------------------
def film_forward(conditions, fused):
    """Nested dict of (B, F, 1, 1) arrays, like FiLM.calculate_film_data.

    `fused` is the output of build_fused_film_params (pre-concatenated and
    pre-padded weights), so the per-step path is: one pallas_call + cheap
    per-leaf slices/reshapes in plain JAX.
    """
    if fused is None:
        return {}

    y_all = film_fused_linear(conditions, fused["w_all_pad"], fused["b_all_pad"])

    film_data = {}
    for path, offset, f in fused["leaf_specs"]:
        y = y_all[:, offset:offset + f][:, :, None, None]          # (B, F, 1, 1)
        node = film_data
        for k in path[:-1]:
            node = node.setdefault(k, {})
        node[path[-1]] = y
    return film_data


if __name__ == "__main__":
    key = jax.random.PRNGKey(0)
    k_cond, k_params = jax.random.split(key)

    batch = 2
    condition_size = 32
    # Nested film_meta like DenseUNet produces: leaf ints = num_features per block.
    film_meta = {
        "encoder_block1": {"conv_block1": {"beta1": 4, "beta2": 4}},
        "encoder_block2": {"conv_block1": {"beta1": 8, "beta2": 8}},
        "decoder_block1": {"conv_block2": {"beta1": 4, "beta2": 4}},
        "after_conv": {"beta1": 16},
    }

    conditions = jax.random.normal(k_cond, (batch, condition_size), jnp.float32)
    params = create_film_params(film_meta, condition_size, k_params)

    # One-time fused-parameter build (hoisted concat + lane padding).
    fused = build_fused_film_params(params)
    fused = jax.block_until_ready(fused)

    film_data = film_forward(conditions, fused)
    film_data = jax.block_until_ready(film_data)

    # Sanity-check against plain-JAX reference (same semantics as nn.Linear).
    def ref_forward(conditions, params):
        out = {}
        for name, p in params.items():
            if isinstance(p, dict):
                out[name] = ref_forward(conditions, p)
            else:
                w, b = p
                out[name] = (conditions @ w + b)[:, :, None, None]
        return out

    ref = ref_forward(conditions, params)

    def check(a, b):
        for k in b:
            if isinstance(b[k], dict):
                check(a[k], b[k])
            else:
                assert a[k].shape == b[k].shape, (a[k].shape, b[k].shape)
                assert jnp.allclose(a[k], b[k], atol=1e-5, rtol=1e-5)

    check(film_data, ref)
    print("KERNEL_OK")
</pallas_src>

<mosaic_0001>
module attributes {stable_mosaic.version = 11 : i64} {
  func.func @_film_fused_kernel(%arg0: memref<2x32xf32, #tpu.memory_space<vmem>>, %arg1: memref<32x128xf32, #tpu.memory_space<vmem>>, %arg2: memref<1x128xf32, #tpu.memory_space<vmem>>, %arg3: memref<2x128xf32, #tpu.memory_space<vmem>>) attributes {dimension_semantics = [], scalar_prefetch = 0 : i64, scratch_operands = 0 : i64, tpu.core_type = #tpu.core_type<tc>} {
    %c0 = arith.constant 0 : index
    %c0_0 = arith.constant 0 : index
    %0 = vector.load %arg0[%c0, %c0_0] : memref<2x32xf32, #tpu.memory_space<vmem>>, vector<2x32xf32>
    %c0_1 = arith.constant 0 : index
    %c0_2 = arith.constant 0 : index
    %1 = vector.load %arg1[%c0_1, %c0_2] : memref<32x128xf32, #tpu.memory_space<vmem>>, vector<32x128xf32>
    %cst = arith.constant dense<0.000000e+00> : vector<2x128xf32>
    %2 = tpu.matmul %0, %1, %cst {dimension_numbers = #tpu.dot_dimension_numbers<[1], [0], [0], [1], [0, 0, 1, 1], [], []>} : vector<2x32xf32>, vector<32x128xf32>, vector<2x128xf32> -> vector<2x128xf32>
    %c0_3 = arith.constant 0 : index
    %c0_4 = arith.constant 0 : index
    %3 = vector.load %arg2[%c0_3, %c0_4] : memref<1x128xf32, #tpu.memory_space<vmem>>, vector<1x128xf32>
    %4 = vector.broadcast %3 : vector<1x128xf32> to vector<2x128xf32>
    %5 = arith.addf %2, %4 : vector<2x128xf32>
    %c0_5 = arith.constant 0 : index
    %c0_6 = arith.constant 0 : index
    %6 = vector.load %arg3[%c0_5, %c0_6] : memref<2x128xf32, #tpu.memory_space<vmem>>, vector<2x128xf32>
    tpu.vector_store %arg3[%c0_5, %c0_6], %5 {strides = array<i32>} : memref<2x128xf32, #tpu.memory_space<vmem>>, vector<2x128xf32>,
    return
  }
}

</mosaic_0001>

<bundles_post_ra>
// kernel: tpu_custom_call.1
= control target key start
LH: loop header
LB: loop body
LE: loop exit
PB: predicated region body
PF: predicated region fallthrough
CT: control target
= control target key end

     0   :  { %8 = vsyncpa [#allocation3], 0  ;;  %s274_s0 = inlined_call_operand.hbm [shape: f32[2,32], index: 0, kind: input, shape index: {}]   ;;  %s275_s1 = inlined_call_operand.hbm [shape: f32[32,128], index: 1, kind: input, shape index: {}]   ;;  %s276_s2 = inlined_call_operand.vmem [shape: f32[1,128], index: 2, kind: input, shape index: {}]   ;;  %s277_s3 = inlined_call_operand.hbm [shape: f32[2,128], index: 3, kind: output, shape index: {}]  }
   0x1   :  { %9 = vsyncpa [#allocation6], 0 }
   0x2   :  { %10 = vsyncpa [#allocation4], 0  ;;  %s235_s12 = smov [#allocation2]   ;;  %s236_s14 = smov [#allocation5]  }
   0x3   :  { %s17_s13 = sshll.u32 %s235_s12, 4  ;;  %s26_s15 = sshll.u32 %s236_s14, 4  ;;  %s18_s13 = int_to_ptr.vmem [resolvable:$true] %s17_s13  ;;  %s27_s15 = int_to_ptr.vmem [resolvable:$true] %s26_s15 }
   0x4   :  { %s177_s16 = scalar_lea.vmem %s18_s13, 32  ;;  %p182_p1 = scmp.lt.s32.totalorder %s18_s13, %s18_s13 }
   0x5   :  { %p178_p0 = scmp.ne.s32.totalorder %s18_s13, %s177_s16  ;;  %p183_p2 = scmp.lt.s32.totalorder %s177_s16, %s177_s16 }
   0x7   :  { %p184_p3 = por %p183_p2, %p182_p1 }
   0x9   :  { %p185_p4 = pnand %p184_p3, %p178_p0 }
   0xb   :  { %188 = shalt.err (!%p185_p4)
}
   0xc   :  { %20 = dma.hbm_to_vmem [thread:$0]  %s274_s0, 32, %s18_s13, [#allocation3]  }
   0xd   :  { %s197_s19 = scalar_lea.vmem %s27_s15, 512  ;;  %p202_p6 = scmp.lt.s32.totalorder %s27_s15, %s27_s15 }
   0xe   :  { %p198_p5 = scmp.ne.s32.totalorder %s27_s15, %s197_s19  ;;  %p203_p7 = scmp.lt.s32.totalorder %s197_s19, %s197_s19 }
  0x10   :  { %p204_p8 = por %p203_p7, %p202_p6 }
  0x12   :  { %p205_p9 = pnand %p204_p8, %p198_p5 }
  0x14   :  { %208 = shalt.err (!%p205_p9)
}
  0x15   :  { %s237_s20 = smov 128   ;;  %s238_s21 = smov 8  }
  0x16   :  { %32 = dma.hbm_to_vmem [thread:$0]  %s275_s1, 512, %s27_s15, [#allocation6], %s237_s20, %s237_s20, %s238_s21  }
  0x17   :  { %229 = dma.done.wait [#allocation3], 32  }
  0x18   :  { %230 = vsyncadd [#allocation3], 4294967264 }
  0x19   :  { %231 = dma.done.wait [#allocation6], 512  }
  0x1a   :  { %232 = vsyncadd [#allocation6], 4294966784  ;;  %v239_v0 = vmov 0.0   ;;  %vm240_vm0 = vmmov 0   ;;  %v45_v1 = vld [vmem:[#allocation5 + $0x18] sm:$0xff]  ;;  %v44_v2 = vld [vmem:[#allocation5 + $0x10] sm:$0xff] }
  0x1b   :  { %151 = vmatprep.subr.mxu0 %v239_v0  ;;  %159 = vmatprep.mubr.msk.f32.mxu0 %vm240_vm0, %v239_v0  ;;  %v43_v3 = vld [vmem:[#allocation5 + $0x8] sm:$0xff]  ;;  %v42_v4 = vld [vmem:[#allocation5] sm:$0xff]  ;;  %v41_v5 = vld [vmem:[#allocation2] sm:$0x3]  ;;  %vm53_vm1 = vcmask 261120   ;;  %s241_s24 = smov [#allocation7]  }
  0x1c   :  { %152 = vmatpush3.msra.mxu0 %v45_v1  ;;  %v144_v6 = vld [vmem:[%s276_s2] ss:$0 sm:$0xff]  ;;  %s134_s25 = sshll.u32 %s241_s24, 4  ;;  %s135_s25 = int_to_ptr.vmem [resolvable:$true] %s134_s25 }
  0x1d   :  { %153 = vmatprep.subr.mxu0 %v239_v0  ;;  %s209_s26 = scalar_lea.vmem %s135_s25, 32  ;;  %p214_p11 = scmp.lt.s32.totalorder %s135_s25, %s135_s25 }
  0x1e   :  { %154 = vmatpush3.msra.mxu0 %v44_v2  ;;  %p210_p10 = scmp.ne.s32.totalorder %s135_s25, %s209_s26  ;;  %p215_p12 = scmp.lt.s32.totalorder %s209_s26, %s209_s26 }
  0x1f   :  { %155 = vmatprep.subr.mxu0 %v239_v0 }
  0x20   :  { %156 = vmatpush3.msra.mxu0 %v43_v3  ;;  %p216_p13 = por %p215_p12, %p214_p11 }
  0x21   :  { %157 = vmatprep.subr.mxu0 %v239_v0 }
  0x22   :  { %158 = vmatpush3.msra.mxu0 %v42_v4  ;;  %p217_p0 = pnand %p216_p13, %p210_p10 }
  0x23   :  { %160 = vmatmul.mubr.msk.f32.vlgmr.msra.gmra.mxu0 %vm53_vm1, %v41_v5 }
  0xe3   :  { %v123_v7 = vpop.f32.mrf.mxu0 }
  0xe4   :  { %v124_v8 = vadd.f32 %v144_v6, %v123_v7 }
  0xe5   :  { %v161_v9 = vpop.f32.mrf.mxu0 }
  0xe6   :  { %127 = vst [vmem:[#allocation7] sm:$0x3] %v124_v8 }
  0xe7   :  { %220 = shalt.err (!%p217_p0)
}
  0xe8   :  { %137 = dma.vmem_to_hbm [thread:$0]  %s135_s25, 32, %s277_s3, [#allocation4]  }
  0xe9   :  { %233 = dma.done.wait [#allocation4], 32  }
  0xea   :  { %234 = vsyncadd [#allocation4], 4294967264 }
  0xeb   :  { %141 = vsyncpa [#allocation3], 1 }
  0xec   :  { %142 = vsyncpa [#allocation6], 1 }
  0xed   :  { %143 = vsyncpa [#allocation4], 1 }

</bundles_post_ra>
